<compile_context>
chip_gen: v7x
topology: tpu7x:2x2x1
jax: 0.10.0
libtpu: 0.0.40
codegen_flags: <defaults>
</compile_context>

<pallas_src>
import functools

import jax
import jax.numpy as jnp
from jax import lax
from jax.experimental import pallas as pl
from jax.experimental.pallas import tpu as pltpu

MM_DTYPE = jnp.bfloat16        # MXU input dtype (f32 accumulation)
ACT_DTYPE = jnp.bfloat16       # HBM dtype for intermediate activations
PER_TAP_MIN_CIN = 256          # im2col single-dot below this, per-tap dots above
VMEM_LIMIT_BYTES = 48 * 1024 * 1024


# ----------------------------------------------------------------------------
# Fused [SnakeBeta] -> Conv1d -> [+residual] -> [+accum] -> [*scale] -> [tanh]
# ----------------------------------------------------------------------------

def _make_fused_conv_kernel(*, K, dil, pad_l, pad_r, T, T_out, Cin, Cout,
                            snake, residual, accum, out_scale, tanh, path):
    def kernel(*refs):
        idx = 0
        x_ref = refs[idx]; idx += 1                       # (1, Cin, T)
        sc_ref = None
        if snake:
            sc_ref = refs[idx]; idx += 1                  # (2, Cin, 1) f32
        w_ref = refs[idx]; idx += 1
        b_ref = refs[idx]; idx += 1                       # (Cout, 1) f32
        res_ref = None
        if residual:
            res_ref = refs[idx]; idx += 1                 # (1, Cout, T_out)
        acc_ref = None
        if accum:
            acc_ref = refs[idx]; idx += 1                 # (1, Cout, T_out)
        o_ref = refs[idx]; idx += 1                       # (1, Cout, T_out)
        col_ref = refs[idx]                               # VMEM scratch (bf16)

        if snake:
            xf = x_ref[0].astype(jnp.float32)             # (Cin, T)
            ea = sc_ref[0]                                # exp(alpha)      (Cin,1)
            ib = sc_ref[1]                                # 1/(exp(beta)+e) (Cin,1)
            sn = jnp.sin(ea * xf)
            xf = xf + ib * (sn * sn)
            xb = xf.astype(MM_DTYPE)                      # cast ONCE to bf16
        else:
            xb = x_ref[0].astype(MM_DTYPE)

        if path == "per_tap":
            # Scratch = padded activation (Cin, T+pad_l+pad_r): 1x VMEM only.
            if pad_l > 0:
                col_ref[:, :pad_l] = jnp.zeros((Cin, pad_l), MM_DTYPE)
            if pad_r > 0:
                col_ref[:, pad_l + T:] = jnp.zeros((Cin, pad_r), MM_DTYPE)
            col_ref[:, pad_l:pad_l + T] = xb
            acc = jnp.dot(w_ref[0], col_ref[:, :T_out],
                          preferred_element_type=jnp.float32)
            for k in range(1, K):
                acc = acc + jnp.dot(w_ref[k],
                                    col_ref[:, k * dil:k * dil + T_out],
                                    preferred_element_type=jnp.float32)
        else:
            # Scratch = padded im2col columns (K*Cin, T_out); row-block k holds
            # x_pad[:, k*dil : k*dil + T_out].  Zero padding written in VMEM.
            for k in range(K):
                off = k * dil - pad_l
                lo = max(0, -off)
                hi = min(T_out, T - off)
                r0, r1 = k * Cin, (k + 1) * Cin
                if lo > 0:
                    col_ref[r0:r1, :lo] = jnp.zeros((Cin, lo), MM_DTYPE)
                if hi < T_out:
                    col_ref[r0:r1, hi:] = jnp.zeros((Cin, T_out - hi), MM_DTYPE)
                if hi > lo:
                    col_ref[r0:r1, lo:hi] = xb[:, lo + off:hi + off]
            if path == "vpu":
                # Cout == 1 (conv_post): skip the MXU entirely.
                acc = jnp.sum(w_ref[...] * col_ref[...].astype(jnp.float32),
                              axis=0, keepdims=True)
            else:
                acc = jnp.dot(w_ref[...], col_ref[...],
                              preferred_element_type=jnp.float32)

        acc = acc + b_ref[...]
        if residual:
            acc = acc + res_ref[0].astype(jnp.float32)
        if accum:
            acc = acc + acc_ref[0].astype(jnp.float32)
        if out_scale != 1.0:
            acc = acc * jnp.float32(out_scale)
        if tanh:
            acc = jnp.tanh(acc)
        o_ref[0] = acc.astype(o_ref.dtype)

    return kernel


def pallas_fused_conv1d(x, w, b, *, dilation=1, pad=0, snake_params=None,
                        residual=None, accum=None, out_scale=1.0,
                        apply_tanh=False, out_dtype=ACT_DTYPE):
    """x: (B, Cin, T); w: (Cout, Cin, K) torch layout; b: (Cout,).

    snake_params: optional (alpha_log, beta_log), each (Cin,) (log-scale).
    residual/accum: optional (B, Cout, T_out) added before scaling.
    """
    B, Cin, T = x.shape
    Cout, _, K = w.shape
    pad_l, pad_r = pad if isinstance(pad, tuple) else (pad, pad)
    T_out = T + pad_l + pad_r - dilation * (K - 1)

    snake = snake_params is not None
    use_res = residual is not None
    use_acc = accum is not None

    if Cout == 1:
        path = "vpu"
        # row k*Cin + ci  <->  w[0, ci, k]
        w_in = jnp.transpose(w[0], (1, 0)).reshape(K * Cin, 1).astype(jnp.float32)
        w_spec = pl.BlockSpec((K * Cin, 1), lambda i: (0, 0))
        scratch = pltpu.VMEM((K * Cin, T_out), MM_DTYPE)
    elif Cin >= PER_TAP_MIN_CIN:
        path = "per_tap"
        w_in = jnp.transpose(w, (2, 0, 1)).astype(MM_DTYPE)          # (K, Cout, Cin)
        w_spec = pl.BlockSpec((K, Cout, Cin), lambda i: (0, 0, 0))
        scratch = pltpu.VMEM((Cin, T + pad_l + pad_r), MM_DTYPE)
    else:
        path = "im2col"
        w_in = jnp.transpose(w, (0, 2, 1)).reshape(Cout, K * Cin).astype(MM_DTYPE)
        w_spec = pl.BlockSpec((Cout, K * Cin), lambda i: (0, 0))
        scratch = pltpu.VMEM((K * Cin, T_out), MM_DTYPE)

    b_in = b.reshape(Cout, 1).astype(jnp.float32)

    inputs = [x]
    in_specs = [pl.BlockSpec((1, Cin, T), lambda i: (i, 0, 0))]
    if snake:
        alpha_log, beta_log = snake_params
        # Packed once per layer: [exp(alpha); 1/(exp(beta)+eps)]  -> one DMA.
        scales = jnp.stack([jnp.exp(alpha_log),
                            1.0 / (jnp.exp(beta_log) + 1e-9)],
                           axis=0).reshape(2, Cin, 1).astype(jnp.float32)
        inputs.append(scales)
        in_specs.append(pl.BlockSpec((2, Cin, 1), lambda i: (0, 0, 0)))
    inputs += [w_in, b_in]
    in_specs += [w_spec, pl.BlockSpec((Cout, 1), lambda i: (0, 0))]
    if use_res:
        inputs.append(residual)
        in_specs.append(pl.BlockSpec((1, Cout, T_out), lambda i: (i, 0, 0)))
    if use_acc:
        inputs.append(accum)
        in_specs.append(pl.BlockSpec((1, Cout, T_out), lambda i: (i, 0, 0)))

    bytes_accessed = (x.size * x.dtype.itemsize + w_in.size * w_in.dtype.itemsize
                      + B * Cout * T_out * jnp.dtype(out_dtype).itemsize)
    if use_res:
        bytes_accessed += residual.size * residual.dtype.itemsize
    if use_acc:
        bytes_accessed += accum.size * accum.dtype.itemsize
    cost = pl.CostEstimate(
        flops=2 * B * Cout * K * Cin * T_out,
        transcendentals=(B * Cin * T if snake else 0)
                        + (B * Cout * T_out if apply_tanh else 0),
        bytes_accessed=int(bytes_accessed))

    kernel = _make_fused_conv_kernel(
        K=K, dil=dilation, pad_l=pad_l, pad_r=pad_r, T=T, T_out=T_out,
        Cin=Cin, Cout=Cout, snake=snake, residual=use_res, accum=use_acc,
        out_scale=float(out_scale), tanh=apply_tanh, path=path)

    return pl.pallas_call(
        kernel,
        out_shape=jax.ShapeDtypeStruct((B, Cout, T_out), out_dtype),
        grid=(B,),
        in_specs=in_specs,
        out_specs=pl.BlockSpec((1, Cout, T_out), lambda i: (i, 0, 0)),
        scratch_shapes=[scratch],
        compiler_params=pltpu.CompilerParams(
            dimension_semantics=("parallel",),
            vmem_limit_bytes=VMEM_LIMIT_BYTES),
        cost_estimate=cost,
    )(*inputs)


# ----------------------------------------------------------------------------
# Polyphase ConvTranspose1d (torch semantics, output_padding=0)
# ----------------------------------------------------------------------------

def _make_convtr_kernel(union_offsets, Cin, T, Tn):
    def kernel(x_ref, w_ref, b_ref, o_ref, col_ref):
        xb = x_ref[0].astype(MM_DTYPE)                    # (Cin, T)
        for u, off in enumerate(union_offsets):
            lo = max(0, -off)
            hi = min(Tn, T - off)
            r0, r1 = u * Cin, (u + 1) * Cin
            if lo > 0:
                col_ref[r0:r1, :lo] = jnp.zeros((Cin, lo), MM_DTYPE)
            if hi < Tn:
                col_ref[r0:r1, hi:] = jnp.zeros((Cin, Tn - hi), MM_DTYPE)
            if hi > lo:
                col_ref[r0:r1, lo:hi] = xb[:, lo + off:hi + off]
        # One merged dot for all `stride` phases (better MXU row fill).
        y = jnp.dot(w_ref[...], col_ref[...], preferred_element_type=jnp.float32)
        o_ref[0] = (y + b_ref[...]).astype(o_ref.dtype)
    return kernel


def pallas_conv_transpose1d(x, w, b, *, stride, padding, out_dtype=ACT_DTYPE):
    """x: (B, Cin, T); w: (Cin, Cout, K) torch layout; b: (Cout,)."""
    B, Cin, T = x.shape
    _, Cout, K = w.shape
    s = stride
    T_out = (T - 1) * s - 2 * padding + K
    assert T_out % s == 0, "polyphase path expects stride | T_out"
    Tn = T_out // s
    pad_eff = K - 1 - padding

    # w_conv[co, ci, k] = w[ci, co, K-1-k]  (flip + channel transpose).
    w_conv = jnp.transpose(w[:, :, ::-1], (1, 0, 2))               # (Cout, Cin, K)

    # Phase r uses taps k = k0_r + j*s with input offset off0_r + j.
    phase_taps = []
    for r in range(s):
        k0 = (pad_eff - r) % s
        d0 = -((pad_eff - r) // s)
        taps, j = {}, 0
        while k0 + j * s < K:
            taps[d0 + j] = k0 + j * s
            j += 1
        phase_taps.append(taps)
    union = sorted({o for taps in phase_taps for o in taps})
    U = len(union)

    # Packed weight (s*Cout, U*Cin): zero blocks where a phase skips an offset.
    zero_blk = jnp.zeros((Cout, Cin), w_conv.dtype)
    rows = []
    for r in range(s):
        blks = [w_conv[:, :, phase_taps[r][o]] if o in phase_taps[r] else zero_blk
                for o in union]
        rows.append(jnp.concatenate(blks, axis=1))
    w_pack = jnp.concatenate(rows, axis=0).astype(MM_DTYPE)        # (s*Cout, U*Cin)
    b_pack = jnp.tile(b.reshape(1, Cout), (s, 1)).reshape(s * Cout, 1)
    b_pack = b_pack.astype(jnp.float32)

    cost = pl.CostEstimate(
        flops=2 * B * s * Cout * U * Cin * Tn,
        transcendentals=0,
        bytes_accessed=int(x.size * x.dtype.itemsize
                           + w_pack.size * w_pack.dtype.itemsize
                           + B * s * Cout * Tn * jnp.dtype(out_dtype).itemsize))

    y_pm = pl.pallas_call(
        _make_convtr_kernel(tuple(union), Cin, T, Tn),
        out_shape=jax.ShapeDtypeStruct((B, s * Cout, Tn), out_dtype),
        grid=(B,),
        in_specs=[
            pl.BlockSpec((1, Cin, T), lambda i: (i, 0, 0)),
            pl.BlockSpec((s * Cout, U * Cin), lambda i: (0, 0)),
            pl.BlockSpec((s * Cout, 1), lambda i: (0, 0)),
        ],
        out_specs=pl.BlockSpec((1, s * Cout, Tn), lambda i: (i, 0, 0)),
        scratch_shapes=[pltpu.VMEM((U * Cin, Tn), MM_DTYPE)],
        compiler_params=pltpu.CompilerParams(
            dimension_semantics=("parallel",),
            vmem_limit_bytes=VMEM_LIMIT_BYTES),
        cost_estimate=cost,
    )(x, w_pack, b_pack)

    # Interleave phases: y[b, c, n*s + r] = y_pm[b, r*Cout + c, n]   (bf16 pass).
    # TODO(synk): consume the phase-major layout directly in the next conv to
    #             remove this transpose entirely.
    y = y_pm.reshape(B, s, Cout, Tn)
    return jnp.transpose(y, (0, 2, 3, 1)).reshape(B, Cout, T_out)


# ----------------------------------------------------------------------------
# Model config / params (deterministic synthetic init)
# ----------------------------------------------------------------------------

class H:
    num_mels = 8
    upsample_initial_channel = 32
    upsample_rates = [2, 2]
    upsample_kernel_sizes = [4, 4]
    resblock = '1'
    resblock_kernel_sizes = [3]
    resblock_dilation_sizes = [[1, 3, 5]]
    activation = 'snakebeta'
    snake_logscale = True


def get_padding(kernel_size, dilation=1):
    return int((kernel_size * dilation - dilation) / 2)


def _nrm(key, shape, std=0.01):
    return std * jax.random.normal(key, shape, dtype=jnp.float32)


def init_params(key, h):
    keys = iter(jax.random.split(key, 4096))
    nk = lambda: next(keys)
    p = {}
    p['conv_pre_w'] = _nrm(nk(), (h.upsample_initial_channel, h.num_mels, 7))
    p['conv_pre_b'] = _nrm(nk(), (h.upsample_initial_channel,))

    num_kernels = len(h.resblock_kernel_sizes)
    p['ups'] = []
    p['resblocks'] = []
    for i, (u, k) in enumerate(zip(h.upsample_rates, h.upsample_kernel_sizes)):
        cin = h.upsample_initial_channel // 2 ** i
        cout = h.upsample_initial_channel // 2 ** (i + 1)
        p['ups'].append({'w': _nrm(nk(), (cin, cout, k)),        # (Cin, Cout, K)
                         'b': _nrm(nk(), (cout,))})
        ch = cout
        for j in range(num_kernels):
            ks = h.resblock_kernel_sizes[j]
            rb = {'c1_w': [], 'c1_b': [], 'c2_w': [], 'c2_b': [],
                  'a1_alpha': [], 'a1_beta': [], 'a2_alpha': [], 'a2_beta': []}
            for _ in range(3):
                rb['c1_w'].append(_nrm(nk(), (ch, ch, ks)))
                rb['c1_b'].append(_nrm(nk(), (ch,)))
                rb['c2_w'].append(_nrm(nk(), (ch, ch, ks)))
                rb['c2_b'].append(_nrm(nk(), (ch,)))
                rb['a1_alpha'].append(_nrm(nk(), (ch,), std=0.1))
                rb['a1_beta'].append(_nrm(nk(), (ch,), std=0.1))
                rb['a2_alpha'].append(_nrm(nk(), (ch,), std=0.1))
                rb['a2_beta'].append(_nrm(nk(), (ch,), std=0.1))
            p['resblocks'].append(rb)

    ch = h.upsample_initial_channel // 2 ** len(h.upsample_rates)
    p['post_alpha'] = _nrm(nk(), (ch,), std=0.1)
    p['post_beta'] = _nrm(nk(), (ch,), std=0.1)
    p['conv_post_w'] = _nrm(nk(), (1, ch, 7))
    p['conv_post_b'] = _nrm(nk(), (1,))
    return p


# ----------------------------------------------------------------------------
# Forward pass (glue around Pallas kernels)
# ----------------------------------------------------------------------------

def amp_block1_forward(rb, x, kernel_size, dilations, accum=None, out_scale=1.0):
    n_layers = len(dilations)
    for l in range(n_layers):
        xt = pallas_fused_conv1d(
            x, rb['c1_w'][l], rb['c1_b'][l],
            dilation=dilations[l], pad=get_padding(kernel_size, dilations[l]),
            snake_params=(rb['a1_alpha'][l], rb['a1_beta'][l]))
        last = (l == n_layers - 1)
        # snake2 + conv2 + residual (+ resblock accumulation / averaging) fused.
        x = pallas_fused_conv1d(
            xt, rb['c2_w'][l], rb['c2_b'][l],
            dilation=1, pad=get_padding(kernel_size, 1),
            snake_params=(rb['a2_alpha'][l], rb['a2_beta'][l]),
            residual=x,
            accum=accum if last else None,
            out_scale=out_scale if last else 1.0)
    return x


def bigvgan_forward(params, x, h):
    num_upsamples = len(h.upsample_rates)
    num_kernels = len(h.resblock_kernel_sizes)

    x = pallas_fused_conv1d(x, params['conv_pre_w'], params['conv_pre_b'],
                            dilation=1, pad=3)
    for i in range(num_upsamples):
        up = params['ups'][i]
        x = pallas_conv_transpose1d(
            x, up['w'], up['b'],
            stride=h.upsample_rates[i],
            padding=(h.upsample_kernel_sizes[i] - h.upsample_rates[i]) // 2)
        xs = None
        for j in range(num_kernels):
            rb = params['resblocks'][i * num_kernels + j]
            last = (j == num_kernels - 1)
            xs = amp_block1_forward(
                rb, x, h.resblock_kernel_sizes[j], h.resblock_dilation_sizes[j],
                accum=xs, out_scale=(1.0 / num_kernels) if last else 1.0)
        x = xs
    # Post SnakeBeta + conv_post (VPU path, Cout=1) + tanh, fused; f32 output.
    x = pallas_fused_conv1d(
        x, params['conv_post_w'], params['conv_post_b'],
        dilation=1, pad=3,
        snake_params=(params['post_alpha'], params['post_beta']),
        apply_tanh=True, out_dtype=jnp.float32)
    return x


# ----------------------------------------------------------------------------
# Pure-JAX references for self-tests
# ----------------------------------------------------------------------------

def _ref_snakebeta(x, alpha_log, beta_log):
    a = jnp.exp(alpha_log)[None, :, None]
    ib = 1.0 / (jnp.exp(beta_log)[None, :, None] + 1e-9)
    s = jnp.sin(a * x)
    return x + ib * s * s


def _ref_conv1d(x, w, b, dilation, pad):
    y = lax.conv_general_dilated(
        x, w, window_strides=(1,), padding=[(pad, pad)],
        rhs_dilation=(dilation,), dimension_numbers=('NCH', 'OIH', 'NCH'))
    return y + b[None, :, None]


def _ref_conv_transpose1d(x, w, b, stride, padding):
    _, _, K = w.shape
    w_conv = jnp.transpose(w[:, :, ::-1], (1, 0, 2))
    y = lax.conv_general_dilated(
        x, w_conv, window_strides=(1,),
        padding=[(K - 1 - padding, K - 1 - padding)],
        lhs_dilation=(stride,), dimension_numbers=('NCH', 'OIH', 'NCH'))
    return y + b[None, :, None]


# ----------------------------------------------------------------------------
# Main
# ----------------------------------------------------------------------------

if __name__ == "__main__":
    h = H()
    key = jax.random.PRNGKey(0)
    k_param, k_in, k1, k2, k3, k4, k5, k6, k7 = jax.random.split(key, 9)

    # ---- op-level self-tests (loose tol: bf16 MXU inputs) ------------------
    # 1) fused snake + dilated conv + residual, im2col path.
    Ci, Co, Tt, Kt, dt = 16, 16, 33, 3, 3
    xt = jax.random.normal(k1, (2, Ci, Tt), jnp.float32)
    wt = 0.1 * jax.random.normal(k2, (Co, Ci, Kt), jnp.float32)
    bt = 0.1 * jax.random.normal(k3, (Co,), jnp.float32)
    al = 0.1 * jax.random.normal(k4, (Ci,), jnp.float32)
    be = 0.1 * jax.random.normal(k5, (Ci,), jnp.float32)
    rs = jax.random.normal(k6, (2, Co, Tt), jnp.float32)
    got = pallas_fused_conv1d(xt, wt, bt, dilation=dt, pad=get_padding(Kt, dt),
                              snake_params=(al, be), residual=rs,
                              out_dtype=jnp.float32)
    want = _ref_conv1d(_ref_snakebeta(xt, al, be), wt, bt, dt,
                       get_padding(Kt, dt)) + rs
    assert jnp.allclose(got, want, atol=5e-2, rtol=5e-2), \
        float(jnp.max(jnp.abs(got - want)))

    # 2) per-tap accumulated-dot path (production-width Cin).
    Ci2, Co2, T2, K2 = PER_TAP_MIN_CIN, 16, 64, 3
    x2 = jax.random.normal(k7, (2, Ci2, T2), jnp.float32)
    w2 = 0.05 * jax.random.normal(k2, (Co2, Ci2, K2), jnp.float32)
    b2 = 0.1 * jax.random.normal(k3, (Co2,), jnp.float32)
    got2 = pallas_fused_conv1d(x2, w2, b2, dilation=1, pad=1,
                               out_dtype=jnp.float32)
    want2 = _ref_conv1d(x2, w2, b2, 1, 1)
    assert jnp.allclose(got2, want2, atol=1e-1, rtol=5e-2), \
        float(jnp.max(jnp.abs(got2 - want2)))

    # 3) polyphase ConvTranspose1d (merged single-dot kernel).
    Ci3, Co3, T3, K3, s3, p3 = 16, 8, 20, 4, 2, 1
    x3 = jax.random.normal(k1, (2, Ci3, T3), jnp.float32)
    w3 = 0.1 * jax.random.normal(k2, (Ci3, Co3, K3), jnp.float32)
    b3 = 0.1 * jax.random.normal(k3, (Co3,), jnp.float32)
    got3 = pallas_conv_transpose1d(x3, w3, b3, stride=s3, padding=p3,
                                   out_dtype=jnp.float32)
    want3 = _ref_conv_transpose1d(x3, w3, b3, s3, p3)
    assert jnp.allclose(got3, want3, atol=5e-2, rtol=5e-2), \
        float(jnp.max(jnp.abs(got3 - want3)))

    # ---- full BigVGAN forward ----------------------------------------------
    params = init_params(k_param, h)
    B, T = 2, 16
    x = jax.random.normal(k_in, (B, h.num_mels, T), dtype=jnp.float32)

    fwd = jax.jit(functools.partial(bigvgan_forward, h=h))
    y = jax.block_until_ready(fwd(params, x))

    expected_T = T
    for u in h.upsample_rates:
        expected_T *= u
    assert y.shape == (B, 1, expected_T), y.shape
    assert y.dtype == jnp.float32
    assert bool(jnp.all(jnp.isfinite(y)))
    assert bool(jnp.all(jnp.abs(y) <= 1.0))  # tanh output range

    print("KERNEL_OK")
</pallas_src>

<mosaic_0001>
module attributes {stable_mosaic.version = 11 : i64} {
  func.func @kernel(%arg0: i32, %arg1: memref<1x16x33xf32, #tpu.memory_space<vmem>>, %arg2: memref<2x16x1xf32, #tpu.memory_space<vmem>>, %arg3: memref<16x48xbf16, #tpu.memory_space<vmem>>, %arg4: memref<16x1xf32, #tpu.memory_space<vmem>>, %arg5: memref<1x16x33xf32, #tpu.memory_space<vmem>>, %arg6: memref<1x16x33xf32, #tpu.memory_space<vmem>>, %arg7: memref<48x33xbf16, #tpu.memory_space<vmem>>) attributes {dimension_semantics = [#tpu.dimension_semantics<parallel>], iteration_bounds = array<i64: 2>, scalar_prefetch = 0 : i64, scratch_operands = 1 : i64, tpu.core_type = #tpu.core_type<tc>, window_params = [{transform_indices = @transform_0, window_bounds = array<i64: 1, 16, 33>}, {pipeline_mode = #tpu.pipeline_mode<synchronous>, transform_indices = @transform_1, window_bounds = array<i64: 2, 16, 1>}, {pipeline_mode = #tpu.pipeline_mode<synchronous>, transform_indices = @transform_2, window_bounds = array<i64: 16, 48>}, {pipeline_mode = #tpu.pipeline_mode<synchronous>, transform_indices = @transform_3, window_bounds = array<i64: 16, 1>}, {transform_indices = @transform_4, window_bounds = array<i64: 1, 16, 33>}, {transform_indices = @transform_5, window_bounds = array<i64: 1, 16, 33>}]} {
    %c0 = arith.constant 0 : index
    %c0_0 = arith.constant 0 : index
    %c0_1 = arith.constant 0 : index
    %0 = vector.load %arg1[%c0, %c0_0, %c0_1] : memref<1x16x33xf32, #tpu.memory_space<vmem>>, vector<1x16x33xf32>
    %1 = vector.shape_cast %0 : vector<1x16x33xf32> to vector<16x33xf32>
    %c0_2 = arith.constant 0 : index
    %c0_3 = arith.constant 0 : index
    %c0_4 = arith.constant 0 : index
    %2 = vector.load %arg2[%c0_2, %c0_3, %c0_4] : memref<2x16x1xf32, #tpu.memory_space<vmem>>, vector<1x16x1xf32>
    %3 = vector.shape_cast %2 : vector<1x16x1xf32> to vector<16x1xf32>
    %c1 = arith.constant 1 : index
    %c0_5 = arith.constant 0 : index
    %c0_6 = arith.constant 0 : index
    %4 = vector.load %arg2[%c1, %c0_5, %c0_6] : memref<2x16x1xf32, #tpu.memory_space<vmem>>, vector<1x16x1xf32>
    %5 = vector.shape_cast %4 : vector<1x16x1xf32> to vector<16x1xf32>
    %6 = vector.broadcast %3 : vector<16x1xf32> to vector<16x33xf32>
    %7 = arith.mulf %6, %1 : vector<16x33xf32>
    %8 = math.sin %7 : vector<16x33xf32>
    %9 = arith.mulf %8, %8 : vector<16x33xf32>
    %10 = vector.broadcast %5 : vector<16x1xf32> to vector<16x33xf32>
    %11 = arith.mulf %10, %9 : vector<16x33xf32>
    %12 = arith.addf %1, %11 : vector<16x33xf32>
    %13 = arith.truncf %12 : vector<16x33xf32> to vector<16x33xbf16>
    %cst = arith.constant 0.000000e+00 : bf16
    %14 = vector.broadcast %cst : bf16 to vector<16x3xbf16>
    %c0_7 = arith.constant 0 : index
    %c0_8 = arith.constant 0 : index
    %15 = vector.load %arg7[%c0_7, %c0_8] : memref<48x33xbf16, #tpu.memory_space<vmem>>, vector<16x3xbf16>
    tpu.vector_store %arg7[%c0_7, %c0_8], %14 {strides = array<i32>} : memref<48x33xbf16, #tpu.memory_space<vmem>>, vector<16x3xbf16>,
    %16 = vector.extract_strided_slice %13 {offsets = [0, 0], sizes = [16, 30], strides = [1, 1]} : vector<16x33xbf16> to vector<16x30xbf16>
    %c0_9 = arith.constant 0 : index
    %c3 = arith.constant 3 : index
    %17 = vector.load %arg7[%c0_9, %c3] : memref<48x33xbf16, #tpu.memory_space<vmem>>, vector<16x30xbf16>
    tpu.vector_store %arg7[%c0_9, %c3], %16 {strides = array<i32>} : memref<48x33xbf16, #tpu.memory_space<vmem>>, vector<16x30xbf16>,
    %c16 = arith.constant 16 : index
    %c0_10 = arith.constant 0 : index
    %18 = vector.load %arg7[%c16, %c0_10] : memref<48x33xbf16, #tpu.memory_space<vmem>>, vector<16x33xbf16>
    tpu.vector_store %arg7[%c16, %c0_10], %13 {strides = array<i32>} : memref<48x33xbf16, #tpu.memory_space<vmem>>, vector<16x33xbf16>,
    %cst_11 = arith.constant 0.000000e+00 : bf16
    %19 = vector.broadcast %cst_11 : bf16 to vector<16x3xbf16>
    %c32 = arith.constant 32 : index
    %c30 = arith.constant 30 : index
    %20 = vector.load %arg7[%c32, %c30] : memref<48x33xbf16, #tpu.memory_space<vmem>>, vector<16x3xbf16>
    tpu.vector_store %arg7[%c32, %c30], %19 {strides = array<i32>} : memref<48x33xbf16, #tpu.memory_space<vmem>>, vector<16x3xbf16>,
    %21 = vector.extract_strided_slice %13 {offsets = [0, 3], sizes = [16, 30], strides = [1, 1]} : vector<16x33xbf16> to vector<16x30xbf16>
    %c32_12 = arith.constant 32 : index
    %c0_13 = arith.constant 0 : index
    %22 = vector.load %arg7[%c32_12, %c0_13] : memref<48x33xbf16, #tpu.memory_space<vmem>>, vector<16x30xbf16>
    tpu.vector_store %arg7[%c32_12, %c0_13], %21 {strides = array<i32>} : memref<48x33xbf16, #tpu.memory_space<vmem>>, vector<16x30xbf16>,
    %c0_14 = arith.constant 0 : index
    %c0_15 = arith.constant 0 : index
    %23 = vector.load %arg3[%c0_14, %c0_15] : memref<16x48xbf16, #tpu.memory_space<vmem>>, vector<16x48xbf16>
    %c0_16 = arith.constant 0 : index
    %c0_17 = arith.constant 0 : index
    %24 = vector.load %arg7[%c0_16, %c0_17] : memref<48x33xbf16, #tpu.memory_space<vmem>>, vector<48x33xbf16>
    %cst_18 = arith.constant dense<0.000000e+00> : vector<16x33xf32>
    %25 = tpu.matmul %23, %24, %cst_18 {dimension_numbers = #tpu.dot_dimension_numbers<[1], [0], [0], [1], [0, 0, 1, 1], [], []>} : vector<16x48xbf16>, vector<48x33xbf16>, vector<16x33xf32> -> vector<16x33xf32>
    %c0_19 = arith.constant 0 : index
    %c0_20 = arith.constant 0 : index
    %26 = vector.load %arg4[%c0_19, %c0_20] : memref<16x1xf32, #tpu.memory_space<vmem>>, vector<16x1xf32>
    %27 = vector.broadcast %26 : vector<16x1xf32> to vector<16x33xf32>
    %28 = arith.addf %25, %27 : vector<16x33xf32>
    %c0_21 = arith.constant 0 : index
    %c0_22 = arith.constant 0 : index
    %c0_23 = arith.constant 0 : index
    %29 = vector.load %arg5[%c0_21, %c0_22, %c0_23] : memref<1x16x33xf32, #tpu.memory_space<vmem>>, vector<1x16x33xf32>
    %30 = vector.shape_cast %29 : vector<1x16x33xf32> to vector<16x33xf32>
    %31 = arith.addf %28, %30 : vector<16x33xf32>
    %c0_24 = arith.constant 0 : index
    %c0_25 = arith.constant 0 : index
    %c0_26 = arith.constant 0 : index
    %32 = vector.load %arg6[%c0_24, %c0_25, %c0_26] : memref<1x16x33xf32, #tpu.memory_space<vmem>>, vector<1x16x33xf32>
    %33 = vector.shape_cast %32 : vector<1x16x33xf32> to vector<16x33xf32>
    %34 = vector.shape_cast %31 : vector<16x33xf32> to vector<1x16x33xf32>
    tpu.vector_store %arg6[%c0_24, %c0_25, %c0_26], %34 {strides = array<i32>} : memref<1x16x33xf32, #tpu.memory_space<vmem>>, vector<1x16x33xf32>,
    return
  }
  func.func @transform_0(%arg0: i32) -> (i32, i32, i32) {
    %c0_i32 = arith.constant 0 : i32
    %c0_i32_0 = arith.constant 0 : i32
    %c0_i32_1 = arith.constant 0 : i32
    return %arg0, %c0_i32, %c0_i32_0 : i32, i32, i32
  }
  func.func @transform_1(%arg0: i32) -> (i32, i32, i32) {
    %c0_i32 = arith.constant 0 : i32
    %c0_i32_0 = arith.constant 0 : i32
    %c0_i32_1 = arith.constant 0 : i32
    %c0_i32_2 = arith.constant 0 : i32
    return %c0_i32, %c0_i32_0, %c0_i32_1 : i32, i32, i32
  }
  func.func @transform_2(%arg0: i32) -> (i32, i32) {
    %c0_i32 = arith.constant 0 : i32
    %c0_i32_0 = arith.constant 0 : i32
    %c0_i32_1 = arith.constant 0 : i32
    return %c0_i32, %c0_i32_0 : i32, i32
  }
  func.func @transform_3(%arg0: i32) -> (i32, i32) {
    %c0_i32 = arith.constant 0 : i32
    %c0_i32_0 = arith.constant 0 : i32
    %c0_i32_1 = arith.constant 0 : i32
    return %c0_i32, %c0_i32_0 : i32, i32
  }
  func.func @transform_4(%arg0: i32) -> (i32, i32, i32) {
    %c0_i32 = arith.constant 0 : i32
    %c0_i32_0 = arith.constant 0 : i32
    %c0_i32_1 = arith.constant 0 : i32
    return %arg0, %c0_i32, %c0_i32_0 : i32, i32, i32
  }
  func.func @transform_5(%arg0: i32) -> (i32, i32, i32) {
    %c0_i32 = arith.constant 0 : i32
    %c0_i32_0 = arith.constant 0 : i32
    %c0_i32_1 = arith.constant 0 : i32
    return %arg0, %c0_i32, %c0_i32_0 : i32, i32, i32
  }
}

</mosaic_0001>

<bundles_post_ra>
// kernel: tpu_custom_call.1
= control target key start
LH: loop header
LB: loop body
LE: loop exit
PB: predicated region body
PF: predicated region fallthrough
CT: control target
= control target key end

     0   :  { %10 = vsyncpa [#allocation4], 0  ;;  %s1206_s0 = inlined_call_operand.vmem [shape: f32[2,16,33], index: 0, kind: input, shape index: {}]   ;;  %s1207_s1 = inlined_call_operand.vmem [shape: f32[2,16,1], index: 1, kind: input, shape index: {}]   ;;  %s1208_s2 = inlined_call_operand.hbm [shape: bf16[16,48], index: 2, kind: input, shape index: {}]   ;;  %s1209_s3 = inlined_call_operand.vmem [shape: f32[16,1], index: 3, kind: input, shape index: {}]   ;;  %s1210_s4 = inlined_call_operand.vmem [shape: f32[2,16,33], index: 4, kind: input, shape index: {}]   ;;  %s1211_s5 = inlined_call_operand.hbm [shape: f32[2,16,33], index: 5, kind: output, shape index: {}]  }
   0x1   :  { %11 = vsyncpa [#allocation5], 0 }
   0x2   :  { %13 = vsyncpa [#allocation5 + $0x1], 0  ;;  %s965_s18 = smov 0   ;;  %s967_s19 = smov 0  }
   0x3   :  { %s969_s20 = smov 0   ;;  %s971_s21 = smov 0  }
   0x4 LB: > { %s986_s22 = sadd.s32 4294967295, %s916_s21   ;;  %s693_s23 = sadd.s32 4294967294, %s916_s21   ;;  %s916_s21 = sphi %s971_s21, %s1227_s21   ;;  %s912_s20 = sphi %s969_s20, %s1226_s20   ;;  %s908_s19 = sphi %s967_s19, %s1225_s19   ;;  %s904_s18 = sphi %s965_s18, %s1224_s18  }
   0x5   : > { %s990_s24 = sadd.s32 1, %s916_s21   ;;  %s141_s25 = sadd.s32 1, %s912_s20 }
   0x6   : > { %s138_s26 = ssub.s32 %s916_s21, %s990_s24  ;;  %p151_p0 = scmp.ne.s32.totalorder %s912_s20, %s908_s19 }
   0x7   : > { %p139_p1 = scmp.eq.s32.totalorder %s138_s26, 0  ;;  %p152_p2 = scmp.eq.s32.totalorder %s986_s22, 1 }
   0x8   : > { %p157_p3 = scmp.ne.s32.totalorder %s908_s19, %s904_s18  ;;  %p158_p4 = scmp.eq.s32.totalorder %s693_s23, 1 }
   0x9   : > { %s1001_s27 = scalar_select %p139_p1, %s912_s20, %s141_s25  }
   0xa   : > { %p1003_p5 = por %p152_p2, %p151_p0  ;;  %p1007_p6 = por %p158_p4, %p157_p3 }
   0xb   : > { %p694_p7 = scmp.ge.s32.totalorder %s916_s21, 1  ;;  %p165_p8 = scmp.lt.s32.totalorder %s916_s21, 3 }
   0xc   : > { %s1215_s28 = scalar_select %p1003_p5, 1, 0 }
   0xd   : > { %s1216_s29 = scalar_select %p1007_p6, 1, 0 }
   0xe   : > { %p1212_p9 = scmp.eq.s32.totalorder %s986_s22, 0  ;;  %p1014_p10 = pnand %p694_p7, %p165_p8 }
   0xf   : > { %s918_s6 = smov [#allocation3]   ;;  %s822_s11 = scalar_lea.hbm %s1208_s2, 128 }
  0x10   : > { %s1217_s30 = scalar_select %p1014_p10, 1, 0 }
  0x11   : > { %s180_s7 = sshll.u32 %s918_s6, 4  ;;  %p752_p11 = pneg %p1014_p10  ;;  %s181_s7 = int_to_ptr.vmem [resolvable:$true] %s180_s7 }
  0x12   : > { %p823_p13 = scmp.ne.s32.totalorder %s1208_s2, %s822_s11  ;;  %p829_p3 = scmp.lt.u32.totalorder %s822_s11, %s1208_s2 }
  0x13   : > { %p1022_p12 = pnand %p1212_p9, %p752_p11 }
  0x15   : > { %p824_p0 = pneg %p1022_p12 }
  0x17   : > { %p825_p1 = pnand %p824_p0, %p823_p13 }
  0x19   : > { %p826_p2 = pneg %p825_p1 }
  0x1b   : > { %p831_p4 = pnand %p829_p3, %p826_p2 }
  0x1d   : > { %834 = shalt.err (!%p831_p4)
}
  0x1e   : > { %s835_s16 = scalar_lea.vmem %s181_s7, 128  ;;  %p843_p9 = scmp.lt.s32.totalorder %s181_s7, %s181_s7 }
  0x1f   : > { %p836_p7 = scmp.ne.s32.totalorder %s181_s7, %s835_s16  ;;  %p844_p6 = scmp.lt.s32.totalorder %s835_s16, %s835_s16 }
  0x21   : > { %p838_p8 = pnand %p836_p7, %p824_p0  ;;  %p845_p5 = por %p844_p6, %p843_p9 }
  0x23   : > { %p839_p11 = pneg %p838_p8 }
  0x25   : > { %p846_p10 = pnand %p845_p5, %p839_p11 }
  0x27   : > { %849 = shalt.err (!%p846_p10)
}
  0x28   : > { %s919_s17 = smov 64   ;;  %s920_s23 = smov 4  }
  0x29   : > { %755 = dma.hbm_to_vmem [thread:$0]  (!%p1022_p12), %s1208_s2, 128, %s181_s7, [#allocation4], %s919_s17, %s919_s17, %s920_s23  }
  0x2a   : > { %p1219_p13 = scmp.ne.s32.totalorder %s1217_s30, 0 }
  0x2b   : > { %p1220_p1 = scmp.eq.s32.totalorder (!%p1219_p13), %s986_s22, 0 }
  0x2c   : > { %215 = sbr.rel (%p1219_p13) target bundleno = 650 (0x28a), region = 40 }
  0x33   : > { %895 = dma.done.wait (%p1220_p1), [#allocation4], 128   ;;  %p1221_p0 = pmov %p1220_p1 }
  0x34   : > { %v921_v0 = vmov 0   ;;  %v261_v1 = vld [vmem:[%s1207_s1] sm:$0xff]  ;;  %v704_v2 = vld [vmem:[%s1207_s1 + $0x10] sm:$0xff]  ;;  %v262_v3 = vld [vmem:[%s1207_s1 + $0x8] sm:$0xff]  ;;  %vm513_vm0 = vcmask 269552   ;;  %p248_p5 = scmp.lt.s32.totalorder %s986_s22, 1 }
  0x35   : > { %897 = vsyncadd (%p1221_p0), [#allocation4], 4294967168  ;;  %811 = vset.pattern.permute.xlu0 %v921_v0  ;;  %812 = vset.pattern.permute.xlu1 %v921_v0  ;;  %v705_v4 = vld [vmem:[%s1207_s1 + $0x18] sm:$0xff]  ;;  %514 = vst.msk [vmem:[#allocation2 + $0x10] sm:$0xff] %vm513_vm0, %v921_v0  ;;  %v922_v27 = vmov 683565275  }
  0x36   : > { %268 = vperm.xlu0 %811, %v261_v1   ;;  %490 = vperm.xlu1 %812, %v704_v2   ;;  %s1065_s13 = scalar_select %p248_p5, %s986_s22, 1  ;;  %v923_v31 = vmov 2475754826   ;;  %v924_v33 = vmov 2131351028  }
  0x37   : > { %v925_v35 = vmov 2102212464   ;;  %v926_v37 = vmov 920167782   ;;  %v927_v44 = vmov 1326507024  }
  0x38   : > { %s721_s14 = sshll.u32 %s1065_s13, 4  ;;  %s929_s23 = smov 125  }
  0x39   : > { %s252_s17 = scalar_lea.vmem %s1206_s0, %s721_s14  ;;  %s930_s25 = smov 3  }
  0x3a   : > { %273 = vperm.xlu0 %811, %v262_v3   ;;  %495 = vperm.xlu1 %812, %v705_v4   ;;  %v1073_v5 = vld [vmem:[%s252_s17] sm:$0xff]  ;;  %v1078_v8 = vld [vmem:[%s252_s17 + $0x8] sm:$0xff]  ;;  %s245_s30 = sand.u32 1, %s908_s19   ;;  %s257_s12 = scalar_lea.vmem %s1210_s4, %s721_s14 }
  0x3b   : > { %s699_s9 = sshll.u32 %s245_s30, 4  ;;  %s723_s15 = sshll.u32 %s986_s22, 8 }
  0x3c   : > { %s247_s16 = scalar_lea.vmem [#allocation6], %s699_s9  ;;  %s1165_s22 = scalar_lea.sflag [#allocation5], %s245_s30 }
  0x3d   : > { %s607_s17 = sshll.u32 %s247_s16, 4  ;;  %p1222_p9 = scmp.ne.s32.totalorder %s1215_s28, 0  ;;  %s1161_s17 = int_to_ptr.vmem [resolvable:$true] %s607_s17 }
  0x3e   : > { %s850_s14 = scalar_lea.vmem %s1161_s17, 256  ;;  %s932_s26 = smov [#allocation6]  }
  0x3f   : > { %p851_p6 = scmp.ne.s32.totalorder %s1161_s17, %s850_s14  ;;  %s854_s6 = sshll.u32 %s932_s26, 4  ;;  %s855_s6 = int_to_ptr.vmem [resolvable:$false] %s854_s6 }
  0x40   : > { %s856_s8 = scalar_lea.vmem %s855_s6, 512  ;;  %p857_p2 = scmp.lt.s32.totalorder %s1161_s17, %s855_s6 }
  0x41   : > { %p852_p10 = pnand %p851_p6, %p1222_p9  ;;  %p858_p3 = scmp.lt.s32.totalorder %s856_s8, %s850_s14 }
  0x43   : > { %p853_p12 = pneg %p852_p10  ;;  %p859_p4 = por %p858_p3, %p857_p2 }
  0x45   : > { %p860_p7 = pnand %p859_p4, %p853_p12 }
  0xb5   : > { %v269_v6 = vpop.permute.xlu0 %268 }
  0xb6   : > { %v1076_v7 = vmul.f32 %v269_v6, %v1073_v5 }
  0xb8   : > { %v278_v9 = vand.u32 2147483647, %v1076_v7  ;;  %v281_v10 = vand.u32 2139095040, %v1076_v7  ;;  %vm280_vm15 = vcmp.lt.s32.totalorder %v1076_v7, 0 }
  0xb9   : > { %v274_v11 = vpop.permute.xlu0 %273 }
  0xba   : > { %v282_v12 = vshrl.u32 %v281_v10, 23  ;;  %v1083_v13 = vmul.f32 %v274_v11, %v1078_v8  ;;  %v285_v14 = vand.u32 8388607, %v278_v9  ;;  %vm279_vm0 = vcmp.le.f32.partialorder %v278_v9, 0.7853982 }
  0xbc   : > { %v706_v15 = vadd.s32 4294967169, %v282_v12  ;;  %v385_v16 = vand.u32 2139095040, %v1083_v13  ;;  %v286_v18 = vor.u32 8388608, %v285_v14  ;;  %v382_v20 = vand.u32 2147483647, %v1083_v13 }
  0xbe   : > { %v288_v17 = vadd.s32 1, %v706_v15  ;;  %v386_v19 = vshrl.u32 %v385_v16, 23  ;;  %v1089_v25 = vshll.u32 %v286_v18, 8  ;;  %v389_v29 = vand.u32 8388607, %v382_v20 }
  0xc0   : > { %vm289_vm1 = vcmp.gt.s32.totalorder %v288_v17, 0  ;;  %v710_v22 = vadd.s32 4294967169, %v386_v19  ;;  %v390_v59 = vor.u32 8388608, %v389_v29 }
  0xc1   : > { %v290_v21 = vsel %vm289_vm1, %v288_v17, 0  ;;  %vm384_vm1 = vcmp.lt.s32.totalorder %v1083_v13, 0 }
  0xc2   : > { %v291_v23 = vshrl.u32 %v290_v21, 5  ;;  %v292_v24 = vand.u32 31, %v290_v21  ;;  %v392_v30 = vadd.s32 1, %v710_v22  ;;  %v430_v14 = vshll.u32 %v390_v59, 8 }
  0xc4   : > { %v293_v26 = vsub.s32 32, %v292_v24  ;;  %v295_v28 = vshll.u32 %v922_v27, %v292_v24  ;;  %v298_v32 = vshll.u32 %v923_v31, %v292_v24  ;;  %v301_v34 = vshll.u32 %v924_v33, %v292_v24 }
  0xc5   : > { %v304_v36 = vshll.u32 %v925_v35, %v292_v24  ;;  %v307_v38 = vshll.u32 %v926_v37, %v292_v24  ;;  %vm310_vm2 = vcmp.lt.s32.totalorder %v291_v23, 1  ;;  %vm312_vm3 = vcmp.lt.s32.totalorder %v291_v23, 3 }
  0xc6   : > { %v296_v39 = vshrl.u32 %v923_v31, %v293_v26  ;;  %v299_v40 = vshrl.u32 %v924_v33, %v293_v26  ;;  %v302_v41 = vshrl.u32 %v925_v35, %v293_v26  ;;  %v294_v42 = vshrl.u32 %v922_v27, %v293_v26 }
  0xc7   : > { %v305_v43 = vshrl.u32 %v926_v37, %v293_v26  ;;  %v308_v45 = vshrl.u32 %v927_v44, %v293_v26  ;;  %vm393_vm4 = vcmp.gt.s32.totalorder %v392_v30, 0  ;;  %vm313_vm5 = vcmp.lt.s32.totalorder %v291_v23, 4 }
  0xc8   : > { %v297_v46 = vor.u32 %v296_v39, %v295_v28  ;;  %v300_v47 = vor.u32 %v299_v40, %v298_v32  ;;  %v303_v48 = vor.u32 %v302_v41, %v301_v34  ;;  %v394_v51 = vsel %vm393_vm4, %v392_v30, 0 }
  0xc9   : > { %v306_v49 = vor.u32 %v305_v43, %v304_v36  ;;  %v309_v50 = vor.u32 %v308_v45, %v307_v38  ;;  %vm311_vm6 = vcmp.lt.s32.totalorder %v291_v23, 2  ;;  %v396_v62 = vand.u32 31, %v394_v51 }
  0xca   : > { %v314_v52 = vsel %vm310_vm2, %v294_v42, %v297_v46  ;;  %v315_v53 = vsel %vm313_vm5, %v303_v48, 2102212464  ;;  %v318_v54 = vsel %vm310_vm2, %v297_v46, %v300_v47  ;;  %v322_v55 = vsel %vm310_vm2, %v300_v47, %v303_v48 }
  0xcb   : > { %v316_v56 = vsel %vm312_vm3, %v300_v47, %v315_v53  ;;  %v319_v57 = vsel %vm313_vm5, %v306_v49, 920167782  ;;  %v323_v58 = vsel %vm313_vm5, %v309_v50, 1326507024  ;;  %v395_v11 = vshrl.u32 %v394_v51, 5 }
  0xcc   : > { %v320_v60 = vsel %vm312_vm3, %v303_v48, %v319_v57  ;;  %v324_v61 = vsel %vm312_vm3, %v306_v49, %v323_v58  ;;  %v317_v63 = vsel %vm311_vm6, %v314_v52, %v316_v56  ;;  %v397_v12 = vsub.s32 32, %v396_v62 }
  0xcd   : > { %v321_v1 = vsel %vm311_vm6, %v318_v54, %v320_v60  ;;  %v325_v2 = vsel %vm311_vm6, %v322_v55, %v324_v61  ;;  %v333_v15 = vmul.u32 %v1089_v25, %v317_v63  ;;  %v399_v16 = vshll.u32 %v922_v27, %v396_v62 }
  0xce   : > { %v1102_v3 = vmul.u32.u64.low %v1089_v25, %v325_v2  ;;  %v1103_v4 = vmul.u32.u64.high %v1089_v25, %v325_v2, %v1102_v3  ;;  %v1106_v6 = vmul.u32.u64.low %v1089_v25, %v321_v1  ;;  %v1107_v10 = vmul.u32.u64.high %v1089_v25, %v321_v1, %v1106_v6 }
  0xcf   : > { %v402_v17 = vshll.u32 %v923_v31, %v396_v62  ;;  %v405_v18 = vshll.u32 %v924_v33, %v396_v62  ;;  %v400_v19 = vshrl.u32 %v923_v31, %v397_v12  ;;  %v403_v21 = vshrl.u32 %v924_v33, %v397_v12 }
  0xd0   : > { %v406_v22 = vshrl.u32 %v925_v35, %v397_v12  ;;  %v408_v23 = vshll.u32 %v925_v35, %v396_v62  ;;  %vm335_vm7 = vc.u32 %v1103_v4, %v1106_v6  ;;  %v336_v24 = vadd.s32 1, %v1107_v10 }
  0xd1   : > { %v409_v26 = vshrl.u32 %v926_v37, %v397_v12  ;;  %v411_v28 = vshll.u32 %v926_v37, %v396_v62  ;;  %v401_v29 = vor.u32 %v400_v19, %v399_v16  ;;  %v404_v30 = vor.u32 %v403_v21, %v402_v17 }
  0xd2   : > { %v407_v32 = vor.u32 %v406_v22, %v405_v18  ;;  %v412_v34 = vshrl.u32 %v927_v44, %v397_v12  ;;  %v337_v25 = vsel %vm335_vm7, %v336_v24, %v1107_v10  ;;  %vm414_vm8 = vcmp.lt.s32.totalorder %v395_v11, 1 }
  0xd3   : > { %v410_v36 = vor.u32 %v409_v26, %v408_v23  ;;  %vm417_vm9 = vcmp.lt.s32.totalorder %v395_v11, 4  ;;  %v338_v31 = vadd.s32 %v337_v25, %v333_v15  ;;  %vm416_vm10 = vcmp.lt.s32.totalorder %v395_v11, 3 }
  0xd4   : > { %v413_v33 = vor.u32 %v412_v34, %v411_v28  ;;  %v419_v35 = vsel %vm417_vm9, %v407_v32, 2102212464  ;;  %v398_v38 = vshrl.u32 %v922_v27, %v397_v12  ;;  %v422_v39 = vsel %vm414_vm8, %v401_v29, %v404_v30 }
  0xd5   : > { %v423_v40 = vsel %vm417_vm9, %v410_v36, 920167782  ;;  %v426_v41 = vsel %vm414_vm8, %v404_v30, %v407_v32  ;;  %v339_v42 = vadd.s32 536870912, %v338_v31  ;;  %vm415_vm11 = vcmp.lt.s32.totalorder %v395_v11, 2 }
  0xd6   : > { %v424_v37 = vsel %vm416_vm10, %v407_v32, %v423_v40  ;;  %v427_v43 = vsel %vm417_vm9, %v413_v33, 1326507024  ;;  %v418_v45 = vsel %vm414_vm8, %v398_v38, %v401_v29  ;;  %v420_v44 = vsel %vm416_vm10, %v404_v30, %v419_v35 }
  0xd7   : > { %v425_v46 = vsel %vm415_vm11, %v422_v39, %v424_v37  ;;  %v428_v47 = vsel %vm416_vm10, %v410_v36, %v427_v43  ;;  %v340_v48 = vshrl.u32 %v339_v42, 30  ;;  %v421_v54 = vsel %vm415_vm11, %v418_v45, %v420_v44 }
  0xd8   : > { %v429_v49 = vsel %vm415_vm11, %v426_v41, %v428_v47  ;;  %v1117_v50 = vmul.u32.u64.low %v430_v14, %v425_v46  ;;  %v1118_v51 = vmul.u32.u64.high %v430_v14, %v425_v46, %v1117_v50  ;;  %v437_v57 = vmul.u32 %v430_v14, %v421_v54 }
  0xd9   : > { %v1120_v52 = vmul.u32.u64.low %v430_v14, %v429_v49  ;;  %v1121_v53 = vmul.u32.u64.high %v430_v14, %v429_v49, %v1120_v52  ;;  %v341_v27 = vshll.u32 %v340_v48, 30  ;;  %v334_v12 = vadd.s32 %v1106_v6, %v1103_v4 }
  0xda   : > { %v440_v56 = vadd.s32 1, %v1118_v51  ;;  %vm383_vm2 = vcmp.le.f32.partialorder %v382_v20, 0.7853982  ;;  %vm370_vm6 = vweird.f32 %v1076_v7  ;;  %vm503_vm8 = vcmask 23552  }
  0xdb   : > { %v342_v55 = vsub.s32 %v338_v31, %v341_v27  ;;  %vm439_vm12 = vc.u32 %v1121_v53, %v1117_v50  ;;  %v438_v25 = vadd.s32 %v1117_v50, %v1121_v53  ;;  %v364_v31 = vsub.s32 4, %v340_v48  ;;  %504 = vst.msk [vmem:[#allocation2] sm:$0xff] %vm503_vm8, %v921_v0  ;;  %v526_v0 = vld [vmem:[%s1209_s3 + $0x8] sm:$0xff] }
  0xdc   : > { %v441_v59 = vsel %vm439_vm12, %v440_v56, %v1118_v51  ;;  %vm474_vm11 = vweird.f32 %v1083_v13  ;;  %vm511_vm12 = vcmask 269312  }
  0xdd   : > { %v344_v58 = vsub.s32 0, %v342_v55  ;;  %v442_v60 = vadd.s32 %v441_v59, %v437_v57  ;;  %v365_v37 = vsel %vm280_vm15, %v364_v31, %v340_v48 }
  0xde   : > { %v367_v46 = vsel %vm279_vm0, 0, %v365_v37 }
  0xdf   : > { %v707_v61 = vmin.u32 %v344_v58, %v342_v55  ;;  %v443_v62 = vadd.s32 536870912, %v442_v60  ;;  %v371_v50 = vadd.s32 3, %v367_v46 }
  0xe1   : > { %v346_v63 = vclz %v707_v61  ;;  %v444_v1 = vshrl.u32 %v443_v62, 30  ;;  %v372_v27 = vand.u32 3, %v371_v50 }
  0xe3   : > { %v708_v2 = vadd.s32 4294967294, %v346_v63  ;;  %v445_v3 = vshll.u32 %v444_v1, 30  ;;  %v468_v49 = vsub.s32 4, %v444_v1  ;;  %vm374_vm3 = vcmp.eq.s32.totalorder %v372_v27, 0 }
  0xe4   : > { %vm377_vm4 = vcmp.eq.s32.totalorder %v372_v27, 2  ;;  %vm373_vm5 = vcmp.lt.s32.totalorder %v372_v27, 2 }
  0xe5   : > { %vm709_vm13 = vcmp.lt.s32.totalorder %v708_v2, 0  ;;  %v446_v11 = vsub.s32 %v442_v60, %v445_v3  ;;  %v469_v9 = vsel %vm384_vm1, %v468_v49, %v444_v1  ;;  %v491_v3 = vpop.permute.xlu1 %490 }
  0xe6   : > { %v349_v10 = vsel %vm709_vm13, 0, %v708_v2  ;;  %v471_v57 = vsel %vm383_vm2, 0, %v469_v9  ;;  %vm931_vm13 = vmmov 0  }
  0xe7   : > { %v350_v15 = vsub.s32 32, %v349_v10  ;;  %v354_v14 = vsub.s32 4294967266, %v349_v10  ;;  %v448_v16 = vsub.s32 0, %v446_v11  ;;  %v351_v17 = vshll.u32 %v342_v55, %v349_v10 }
  0xe8   : > { %v475_v60 = vadd.s32 3, %v471_v57 }
  0xe9   : > { %v352_v18 = vshrl.u32 %v334_v12, %v350_v15  ;;  %v355_v19 = vadd.s32 127, %v354_v14  ;;  %v711_v21 = vmin.u32 %v448_v16, %v446_v11  ;;  %v928_v15 = vmov 0.0  }
  0xea   : > { %v476_v62 = vand.u32 3, %v475_v60  ;;  %728 = vmatprep.subr.bf16.mxu0 %v928_v15  ;;  %734 = vmatprep.mubr.msk.bf16.mxu0 %vm931_vm13, %v928_v15 }
  0xeb   : > { %v353_v22 = vor.u32 %v352_v18, %v351_v17  ;;  %v356_v23 = vshll.u32 %v355_v19, 23  ;;  %v450_v24 = vclz %v711_v21  ;;  %v496_v19 = vpop.permute.xlu1 %495 }
  0xec   : > { %vm481_vm7 = vcmp.eq.s32.totalorder %v476_v62, 2  ;;  %vm478_vm9 = vcmp.eq.s32.totalorder %v476_v62, 0  ;;  %vm477_vm10 = vcmp.lt.s32.totalorder %v476_v62, 2 }
  0xed   : > { %v357_v26 = vor.u32 4788187, %v356_v23  ;;  %v712_v28 = vadd.s32 4294967294, %v450_v24  ;;  %v360_v30 = vcvt.s32.f32 %v353_v22 }
  0xef   : > { %v358_v29 = vand.u32 2147483647, %v357_v26  ;;  %vm713_vm14 = vcmp.lt.s32.totalorder %v712_v28, 0 }
  0xf0   : > { %v453_v34 = vsel %vm713_vm14, 0, %v712_v28  ;;  %vm518_vm14 = vcmask 244736  }
  0xf1   : > { %v361_v32 = vmul.f32 %v360_v30, %v358_v29  ;;  %v454_v4 = vsub.s32 32, %v453_v34  ;;  %v458_v6 = vsub.s32 4294967266, %v453_v34  ;;  %v455_v33 = vshll.u32 %v446_v11, %v453_v34  ;;  %v813_v30 = vld [vmem:[#allocation3] sm:$0xff]  }
  0xf3   : > { %v362_v36 = vxor.u32 2147483648, %v361_v32  ;;  %v456_v35 = vshrl.u32 %v438_v25, %v454_v4  ;;  %v459_v38 = vadd.s32 127, %v458_v6  ;;  %v587_v25 = vld [vmem:[%s257_s12] sm:$0xff] }
  0xf5   : > { %v363_v39 = vsel %vm280_vm15, %v362_v36, %v361_v32  ;;  %v457_v40 = vor.u32 %v456_v35, %v455_v33  ;;  %v460_v41 = vshll.u32 %v459_v38, 23  ;;  %vm509_vm15 = vcmask 269336   ;;  %v588_v33 = vld [vmem:[%s257_s12 + $0x8] sm:$0xff] }
  0xf6   : > { %v366_v42 = vsel %vm279_vm0, %v1076_v7, %v363_v39  ;;  %vm542_vm0 = vcmask 392192  }
  0xf7   : > { %814 = vcosq.f32 %v366_v42  ;;  %v461_v43 = vor.u32 4788187, %v460_v41  ;;  %v464_v44 = vcvt.s32.f32 %v457_v40 }
  0xf8   : > { %816 = vsinq.f32 %v366_v42 }
  0xf9   : > { %v462_v45 = vand.u32 2147483647, %v461_v43 }
  0xfb   : > { %v465_v47 = vmul.f32 %v464_v44, %v462_v45 }
  0xfd   : > { %v466_v51 = vxor.u32 2147483648, %v465_v47 }
  0xff   : > { %v467_v52 = vsel %vm384_vm1, %v466_v51, %v465_v47 }
 0x100   : > { %v470_v48 = vsel %vm383_vm2, %v1083_v13, %v467_v52  ;;  %v525_v13 = vld [vmem:[%s1209_s3] sm:$0xff] }
 0x101   : > { %v815_v53 = vpop.eup %814  ;;  %818 = vcosq.f32 %v470_v48 }
 0x102   : > { %v817_v54 = vpop.eup %816  ;;  %v378_v55 = vxor.u32 2147483648, %v815_v53  ;;  %820 = vsinq.f32 %v470_v48 }
 0x103   : > { %v375_v56 = vxor.u32 2147483648, %v817_v54 }
 0x104   : > { %v379_v59 = vsel %vm377_vm4, %v378_v55, %v817_v54 }
 0x105   : > { %v376_v58 = vsel %vm374_vm3, %v815_v53, %v375_v56 }
 0x106   : > { %v380_v61 = vsel %vm373_vm5, %v376_v58, %v379_v59 }
 0x107   : > { %v381_v63 = vsel %vm370_vm6, nan, %v380_v61 }
 0x108   : > { %v486_v11 = vmul.f32 %v381_v63, %v381_v63 }
 0x10a   : > { %v498_v17 = vmul.f32 %v491_v3, %v486_v11 }
 0x10b   : > { %v819_v20 = vpop.eup %818 }
 0x10c   : > { %v821_v1 = vpop.eup %820  ;;  %v482_v2 = vxor.u32 2147483648, %v819_v20  ;;  %v500_v22 = vadd.f32 %v498_v17, %v1073_v5 }
 0x10d   : > { %v479_v10 = vxor.u32 2147483648, %v821_v1 }
 0x10e   : > { %v483_v12 = vsel %vm481_vm7, %v482_v2, %v821_v1 }
 0x10f   : > { %v480_v14 = vsel %vm478_vm9, %v819_v20, %v479_v10 }
 0x110   : > { %v484_v7 = vsel %vm477_vm10, %v480_v14, %v483_v12 }
 0x111   : > { %v485_v16 = vsel %vm474_vm11, nan, %v484_v7 }
 0x112   : > { %v487_v18 = vmul.f32 %v485_v16, %v485_v16 }
 0x114   : > { %v499_v21 = vmul.f32 %v496_v19, %v487_v18 }
 0x116   : > { %v501_v23 = vadd.f32 %v499_v21, %v1078_v8 }
 0x118   : > { %v502_v24 = vpack.c.bf16 %v501_v23, %v500_v22 }
 0x11a   : > { %515 = vrot.lane.b32.xlu1 %v502_v24, %s929_s23  ;;  %512 = vst.msk [vmem:[#allocation2 + $0x8] sm:$0xff] %vm511_vm12, %v502_v24  ;;  %506 = vrot.lane.b32.xlu0 %v502_v24, %s930_s25  ;;  %s1159_s25 = scalar_lea.hbm %s1211_s5, %s723_s15 }
 0x11e   : > { %534 = vperm.xlu1 %812, %v526_v0   ;;  %529 = vperm.xlu0 %811, %v525_v13  }
 0x121   : > { %v523_v28 = vld [vmem:[#allocation2 + $0x8] sm:$0xff] }
 0x18c   : > { %v516_v5 = vpop.permute.xlu1 %515  ;;  %v507_v8 = vpop.permute.xlu0 %506 }
 0x18d   : > { %519 = vst.msk [vmem:[#allocation2 + $0x10] sm:$0xff] %vm518_vm14, %v516_v5 }
 0x18e   : > { %510 = vst.msk [vmem:[#allocation2] sm:$0xff] %vm509_vm15, %v507_v8 }
 0x194   : > { %v524_v29 = vld [vmem:[#allocation2 + $0x10] sm:$0xff] }
 0x195   : > { %v522_v26 = vld [vmem:[#allocation2] sm:$0xff] }
 0x196   : > { %729 = vmatpush3.bf16.msra.mxu0 %v522_v26 }
 0x197   : > { %730 = vmatprep.subr.bf16.mxu0 %v928_v15 }
 0x19a   : > { %731 = vmatpush3.bf16.msra.mxu0 %v523_v28 }
 0x19b   : > { %732 = vmatprep.subr.bf16.mxu0 %v928_v15 }
 0x19d   : > { %v530_v32 = vpop.permute.xlu0 %529  ;;  %v535_v36 = vpop.permute.xlu1 %534 }
 0x19e   : > { %733 = vmatpush3.bf16.msra.mxu0 %v524_v29 }
 0x1a1   : > { %735 = vmatmul.mubr.msk.bf16.vlgmr.msra.gmra.mrb[0].mxu0 %vm542_vm0, %v813_v30 }
 0x274   : > { %v580_v34 = vpop.f32.mrb[0].mxu0 }
 0x275   : > { %v581_v4 = vadd.f32 %v580_v34, %v530_v32  ;;  %v736_v6 = vpop.f32.mrb[1].mxu0 }
 0x276   : > { %v583_v31 = vpop.f32.mrb[2].mxu0 }
 0x277   : > { %v589_v35 = vadd.f32 %v587_v25, %v581_v4  ;;  %v584_v38 = vadd.f32 %v583_v31, %v535_v36  ;;  %v737_v39 = vpop.f32.mrb[3].mxu0 }
 0x279   : > { %591 = vst.msk [vmem:[%s247_s16] sm:$0xff] %vm511_vm12, %v589_v35  ;;  %v590_v40 = vadd.f32 %v588_v33, %v584_v38 }
 0x27b   : > { %592 = vst.msk [vmem:[%s247_s16 + $0x8] sm:$0xff] %vm511_vm12, %v590_v40 }
 0x27c   : > { %863 = shalt.err (!%p860_p7)
}
 0x27d   : > { %s864_s7 = scalar_lea.hbm %s1159_s25, 256  ;;  %s868_s10 = scalar_lea.hbm %s1211_s5, 512 }
 0x27e   : > { %p865_p8 = scmp.ne.s32.totalorder %s1159_s25, %s864_s7  ;;  %p869_p1 = scmp.lt.u32.totalorder %s1159_s25, %s1211_s5 }
 0x27f   : > { %p870_p0 = scmp.lt.u32.totalorder %s868_s10, %s864_s7  ;;  %p872_p6 = scmp.lt.u32.totalorder %s864_s7, %s1159_s25 }
 0x280   : > { %p866_p11 = pnand %p865_p8, %p1222_p9 }
 0x281   : > { %p871_p5 = por %p870_p0, %p869_p1 }
 0x282   : > { %p867_p13 = pneg %p866_p11 }
 0x283   : > { %p873_p10 = por %p872_p6, %p871_p5 }
 0x285   : > { %p874_p12 = pnand %p873_p10, %p867_p13 }
 0x287   : > { %877 = shalt.err (!%p874_p12)
}
 0x288   : > { %s933_s15 = smov 128   ;;  %s934_s16 = smov 8  }
 0x289   : > { %750 = dma.vmem_to_hbm [thread:$0]  (%p1222_p9), %s1161_s17, 256, %s1159_s25, %s1165_s22, %s933_s15, %s933_s15, %s934_s16  }
 0x28a PF: > { %p762_p2 = scmp.ge.s32.totalorder %s916_s21, 2  ;;  %s622_s13 = sand.u32 1, %s904_s18  }
 0x28b   : > { %p1223_p3 = scmp.ne.s32.totalorder %s1216_s29, 0  ;;  %s623_s23 = scalar_lea.sflag [#allocation5], %s622_s13 }
 0x28d   : > { %p757_p4 = pnand %p762_p2, %p1223_p3 }
 0x28f   : > { %899 = dma.done.wait (!%p757_p4), %s623_s23, 256  }
 0x290   : > { %901 = vsyncadd (!%p757_p4), %s623_s23, 4294967040  ;;  %p16_p7 = scmp.ge.s32.totalorder %s990_s24, 4   ;;  %s1224_s18 = smov %s908_s19 }
 0x291   : > { %s1225_s19 = smov %s912_s20  ;;  %s1226_s20 = smov %s1001_s27 }
 0x292   : > { %s1227_s21 = smov %s990_s24  ;;  %18 = sbr.rel (!%p16_p7) target bundleno = 4 (0x4), region = 84 }
 0x299   :  { %628 = vsyncpa [#allocation4], 1 }
 0x29a   :  { %630 = vsyncpa [#allocation4 + $0x1], 1 }
 0x29b   :  { %631 = vsyncpa [#allocation5], 1 }
 0x29c   :  { %633 = vsyncpa [#allocation5 + $0x1], 1 }

</bundles_post_ra>
